<compile_context>
chip_gen: v7x
topology: tpu7x:2x2x1
jax: 0.10.0
libtpu: 0.0.40
codegen_flags: <defaults>
</compile_context>

<pallas_src>
import jax
import jax.numpy as jnp
from jax import lax
from jax.experimental import pallas as pl
from jax.experimental.pallas import tpu as pltpu

EPS = 1e-5          # PyTorch InstanceNorm1d default eps
KSIZE = 7           # Conv1d kernel_size
PAD = 3             # Conv1d padding
LANE = 128


def _round_up(n, m):
    return ((n + m - 1) // m) * m


# ----------------------------------------------------------------------------
# In-kernel helpers (traced inside the Pallas kernel)
# ----------------------------------------------------------------------------
def _inorm(x):
    """InstanceNorm1d (affine=False, no running stats): normalize over L per (b, c).

    Centered two-pass moments (review fix: avoid E[x^2]-E[x]^2 cancellation)."""
    m = jnp.mean(x, axis=1, keepdims=True)
    xc = x - m
    var = jnp.mean(xc * xc, axis=1, keepdims=True)
    return xc * lax.rsqrt(var + EPS)


def _relu(x):
    return jnp.maximum(x, 0.0)


def _im2col(xp_ref, xc_ref, xval, L, c, kpad):
    """Build the im2col buffer for a k=7, pad=3 conv with scratch stores (no concat).

    xp_ref : (bt, L+6, c)   f32 scratch -- zero halos, x stored at sublane offset 3
    xc_ref : (bt, L, kpad)  f32 scratch -- 7 static-offset column stores
    xval   : (bt, L, c)     f32 value to convolve
    """
    bt = xval.shape[0]
    xp_ref[:, :PAD, :] = jnp.zeros((bt, PAD, c), jnp.float32)
    xp_ref[:, PAD + L:, :] = jnp.zeros((bt, PAD, c), jnp.float32)
    xp_ref[:, PAD:PAD + L, :] = xval
    for k in range(KSIZE):
        xc_ref[:, :, k * c:(k + 1) * c] = xp_ref[:, k:k + L, :]
    if KSIZE * c < kpad:
        # Padded-K tail lanes must be zero: the matching weight rows are zero, but
        # uninitialised scratch could hold NaN/Inf (0 * NaN = NaN).  Re-zeroed every
        # step since each TensorCore owns its own scratch under "parallel" sharding.
        xc_ref[:, :, KSIZE * c:] = jnp.zeros((bt, L, kpad - KSIZE * c), jnp.float32)


# ----------------------------------------------------------------------------
# Fused kernel factory: one grid step == B_TILE samples' full seqBlock forward
# ----------------------------------------------------------------------------
def _make_kernel(bt, L, cin, cout, k1, k2, has_ds):
    n1 = 2 * cout if has_ds else cout

    def kernel(x_ref, w1_ref, w2_ref, o_ref, xp1, xc1, xp2, xc2):
        x = x_ref[...]                                               # (bt, L, cin) f32

        # ---- conv1 (+ fused conv1x1 downsample) as ONE bf16 im2col matmul ----
        _im2col(xp1, xc1, x, L, cin, k1)
        a1 = xc1[...].reshape(bt * L, k1).astype(jnp.bfloat16)
        y1 = jnp.dot(a1, w1_ref[...], preferred_element_type=jnp.float32)  # (bt*L, n1)
        y1 = y1.reshape(bt, L, n1)
        h = _relu(_inorm(y1[:, :, :cout]))                           # bn1 + ReLU, f32
        res = _inorm(y1[:, :, cout:]) if has_ds else x               # shortcut

        # ---- conv2 ----
        _im2col(xp2, xc2, h, L, cout, k2)
        a2 = xc2[...].reshape(bt * L, k2).astype(jnp.bfloat16)
        y2 = jnp.dot(a2, w2_ref[...], preferred_element_type=jnp.float32)  # (bt*L, cout)
        y2 = y2.reshape(bt, L, cout)

        o_ref[...] = _relu(_inorm(y2) + res)

    return kernel


# ----------------------------------------------------------------------------
# VMEM budgeting: pick B_TILE and the explicit vmem limit per generation-safe budget
# ----------------------------------------------------------------------------
def _step_vmem_bytes(bt, L, cin, cout, k1, k2, n1):
    io = 2 * bt * L * (cin + cout) * 4                    # double-buffered x / out blocks
    w = 2 * (k1 * n1 + k2 * cout) * 2                     # resident bf16 weights (2 bufs)
    scratch = bt * ((L + 2 * PAD) * (cin + cout) + L * (k1 + k2)) * 4
    interm = bt * L * (n1 + 3 * cout + cin) * 4           # rough f32 value temporaries
    return io + w + scratch + interm


def _choose_btile(B, L, cin, cout, k1, k2, n1, budget=8 << 20):
    """Largest divisor of B whose per-step footprint fits a conservative budget.

    Bigger B_TILE amortises the ~0.35us/step pipeline overhead and fills MXU rows;
    the 8 MiB budget keeps the tiling safe on v7x (64 MiB VMEM) and v5e."""
    best = 1
    for bt in range(1, B + 1):
        if B % bt == 0 and _step_vmem_bytes(bt, L, cin, cout, k1, k2, n1) <= budget:
            best = bt
    return best


# ----------------------------------------------------------------------------
# pallas_call wrapper: ONE launch per seqBlock forward
# ----------------------------------------------------------------------------
def seq_block_forward(x, params):
    """x: (B, L, Cin) float32, channel-last.  Returns (B, L, Cout) float32."""
    B, L, cin = x.shape
    w1p = params["w1_packed"]                 # (K1, N1)  bf16
    w2p = params["w2_packed"]                 # (K2, Cout) bf16
    has_ds = bool(params["has_downsample"])
    k1, n1 = w1p.shape
    k2, cout = w2p.shape
    if not has_ds:
        assert cin == cout, "identity residual requires inplanes == planes"

    bt = _choose_btile(B, L, cin, cout, k1, k2, n1)
    nb = B // bt
    est = _step_vmem_bytes(bt, L, cin, cout, k1, k2, n1)
    vmem_limit = int(min(64 << 20, max(32 << 20, 2 * est)))

    kernel = _make_kernel(bt, L, cin, cout, k1, k2, has_ds)

    return pl.pallas_call(
        kernel,
        out_shape=jax.ShapeDtypeStruct((B, L, cout), jnp.float32),
        grid=(nb,),
        in_specs=[
            pl.BlockSpec((bt, L, cin), lambda b: (b, 0, 0)),   # activation slab
            pl.BlockSpec((k1, n1), lambda b: (0, 0)),          # resident packed weights
            pl.BlockSpec((k2, cout), lambda b: (0, 0)),
        ],
        out_specs=pl.BlockSpec((bt, L, cout), lambda b: (b, 0, 0)),
        scratch_shapes=[
            pltpu.VMEM((bt, L + 2 * PAD, cin), jnp.float32),   # xp1: padded slab, conv1
            pltpu.VMEM((bt, L, k1), jnp.float32),              # xc1: im2col, conv1
            pltpu.VMEM((bt, L + 2 * PAD, cout), jnp.float32),  # xp2: padded slab, conv2
            pltpu.VMEM((bt, L, k2), jnp.float32),              # xc2: im2col, conv2
        ],
        compiler_params=pltpu.CompilerParams(
            dimension_semantics=("parallel",),
            vmem_limit_bytes=vmem_limit,
        ),
    )(x, w1p, w2p)


# ----------------------------------------------------------------------------
# Host-side weight packing (im2col layout, K padded to a multiple of 128, bf16)
# ----------------------------------------------------------------------------
def _pack_conv7_weight(w):
    """PyTorch Conv1d weight (Cout, Cin, 7) -> (round_up(7*Cin,128), Cout) bf16."""
    cout, cin, k = w.shape
    kc = k * cin
    kpad = _round_up(kc, LANE)
    wf = jnp.transpose(w, (2, 1, 0)).reshape(kc, cout)       # row index = tap*cin + c
    wf = jnp.pad(wf, ((0, kpad - kc), (0, 0)))
    return wf.astype(jnp.bfloat16)


def _pack_conv1_weight(w1, wd):
    """Pack conv1 weight; if wd (Cout, Cin, 1) is given, fold the conv1x1 downsample
    into extra output columns (its rows land at tap k=3, which multiplies x itself)."""
    cout, cin, k = w1.shape
    kc = k * cin
    kpad = _round_up(kc, LANE)
    wf = jnp.transpose(w1, (2, 1, 0)).reshape(kc, cout)
    wf = jnp.pad(wf, ((0, kpad - kc), (0, 0)))
    if wd is None:
        return wf.astype(jnp.bfloat16)
    wd2 = jnp.transpose(wd[:, :, 0], (1, 0))                 # (Cin, Cout)
    ds_cols = jnp.zeros((kpad, cout), jnp.float32)
    ds_cols = ds_cols.at[PAD * cin:(PAD + 1) * cin, :].set(wd2)
    return jnp.concatenate([wf, ds_cols], axis=1).astype(jnp.bfloat16)


def init_seqblock_params(key, inplanes, planes, scale=0.1):
    k1, k2, k3 = jax.random.split(key, 3)
    w1 = jax.random.normal(k1, (planes, inplanes, KSIZE), jnp.float32) * scale
    w2 = jax.random.normal(k2, (planes, planes, KSIZE), jnp.float32) * scale
    params = {"w1": w1, "w2": w2}                 # raw weights (pure-JAX reference)
    wd = None
    if inplanes != planes:                        # canonical downsample: conv1x1 + IN
        wd = jax.random.normal(k3, (planes, inplanes, 1), jnp.float32) * scale
        params["wd"] = wd
    params["w1_packed"] = _pack_conv1_weight(w1, wd)
    params["w2_packed"] = _pack_conv7_weight(w2)
    params["has_downsample"] = wd is not None
    return params


# ----------------------------------------------------------------------------
# Pure-JAX reference (independent f32 formulation) for correctness checking
# ----------------------------------------------------------------------------
def _ref_conv(x, w, pad):
    """x: (B, L, Cin), w: (Cout, Cin, K)."""
    B, L, _ = x.shape
    K = w.shape[2]
    xp = jnp.pad(x, ((0, 0), (pad, pad), (0, 0)))
    out = jnp.zeros((B, L, w.shape[0]), jnp.float32)
    for k in range(K):
        out = out + jnp.einsum("blc,oc->blo", xp[:, k:k + L, :], w[:, :, k])
    return out


def _ref_inorm(x):
    mean = jnp.mean(x, axis=1, keepdims=True)
    var = jnp.mean((x - mean) ** 2, axis=1, keepdims=True)
    return (x - mean) / jnp.sqrt(var + EPS)


def ref_seq_block(x, params):
    out = jax.nn.relu(_ref_inorm(_ref_conv(x, params["w1"], PAD)))
    out = _ref_inorm(_ref_conv(out, params["w2"], PAD))
    if "wd" in params:
        res = _ref_inorm(_ref_conv(x, params["wd"], 0))
    else:
        res = x
    return jax.nn.relu(out + res)


# ----------------------------------------------------------------------------
if __name__ == "__main__":
    B, L = 2, 16
    key = jax.random.PRNGKey(0)
    kx, kx2, kp1, kp2 = jax.random.split(key, 4)

    # --- case 1: identity residual (inplanes == planes == 32) ----------------
    inplanes = planes = 32
    x = jax.random.normal(kx, (B, L, inplanes), jnp.float32)
    p1 = init_seqblock_params(kp1, inplanes, planes)
    y1 = seq_block_forward(x, p1)
    jax.block_until_ready(y1)
    assert y1.shape == (B, L, planes)
    r1 = ref_seq_block(x, p1)
    # bf16 MXU operands -> tolerance loosened vs. pure-f32 (per review note).
    assert bool(jnp.allclose(y1, r1, atol=5e-2, rtol=5e-2)), \
        float(jnp.max(jnp.abs(y1 - r1)))

    # --- case 2: channel-changing block with conv1x1+IN downsample -----------
    inplanes2, planes2 = 16, 32
    x2 = jax.random.normal(kx2, (B, L, inplanes2), jnp.float32)
    p2 = init_seqblock_params(kp2, inplanes2, planes2)
    y2 = seq_block_forward(x2, p2)
    jax.block_until_ready(y2)
    assert y2.shape == (B, L, planes2)
    r2 = ref_seq_block(x2, p2)
    assert bool(jnp.allclose(y2, r2, atol=5e-2, rtol=5e-2)), \
        float(jnp.max(jnp.abs(y2 - r2)))

    # TODO(synk): `self.activation = nn.ReLU` in the PyTorch module stores the class
    # instead of applying it; implemented here as the intended elementwise ReLU.
    print("KERNEL_OK")
</pallas_src>

<mosaic_0001>
module attributes {stable_mosaic.version = 11 : i64} {
  func.func @kernel(%arg0: i32, %arg1: memref<2x16x32xf32, #tpu.memory_space<vmem>>, %arg2: memref<256x32xbf16, #tpu.memory_space<vmem>>, %arg3: memref<256x32xbf16, #tpu.memory_space<vmem>>, %arg4: memref<2x16x32xf32, #tpu.memory_space<vmem>>, %arg5: memref<2x22x32xf32, #tpu.memory_space<vmem>>, %arg6: memref<2x16x256xf32, #tpu.memory_space<vmem>>, %arg7: memref<2x22x32xf32, #tpu.memory_space<vmem>>, %arg8: memref<2x16x256xf32, #tpu.memory_space<vmem>>) attributes {dimension_semantics = [#tpu.dimension_semantics<parallel>], iteration_bounds = array<i64: 1>, scalar_prefetch = 0 : i64, scratch_operands = 4 : i64, tpu.core_type = #tpu.core_type<tc>, window_params = [{transform_indices = @transform_0, window_bounds = array<i64: 2, 16, 32>}, {pipeline_mode = #tpu.pipeline_mode<synchronous>, transform_indices = @transform_1, window_bounds = array<i64: 256, 32>}, {pipeline_mode = #tpu.pipeline_mode<synchronous>, transform_indices = @transform_2, window_bounds = array<i64: 256, 32>}, {transform_indices = @transform_3, window_bounds = array<i64: 2, 16, 32>}]} {
    %c0 = arith.constant 0 : index
    %c0_0 = arith.constant 0 : index
    %c0_1 = arith.constant 0 : index
    %0 = vector.load %arg1[%c0, %c0_0, %c0_1] : memref<2x16x32xf32, #tpu.memory_space<vmem>>, vector<2x16x32xf32>
    %cst = arith.constant 0.000000e+00 : f32
    %1 = vector.broadcast %cst : f32 to vector<2x3x32xf32>
    %c0_2 = arith.constant 0 : index
    %c0_3 = arith.constant 0 : index
    %c0_4 = arith.constant 0 : index
    %2 = vector.load %arg5[%c0_2, %c0_3, %c0_4] : memref<2x22x32xf32, #tpu.memory_space<vmem>>, vector<2x3x32xf32>
    tpu.vector_store %arg5[%c0_2, %c0_3, %c0_4], %1 {strides = array<i32>} : memref<2x22x32xf32, #tpu.memory_space<vmem>>, vector<2x3x32xf32>,
    %cst_5 = arith.constant 0.000000e+00 : f32
    %3 = vector.broadcast %cst_5 : f32 to vector<2x3x32xf32>
    %c0_6 = arith.constant 0 : index
    %c19 = arith.constant 19 : index
    %c0_7 = arith.constant 0 : index
    %4 = vector.load %arg5[%c0_6, %c19, %c0_7] : memref<2x22x32xf32, #tpu.memory_space<vmem>>, vector<2x3x32xf32>
    tpu.vector_store %arg5[%c0_6, %c19, %c0_7], %3 {strides = array<i32>} : memref<2x22x32xf32, #tpu.memory_space<vmem>>, vector<2x3x32xf32>,
    %c0_8 = arith.constant 0 : index
    %c3 = arith.constant 3 : index
    %c0_9 = arith.constant 0 : index
    %5 = vector.load %arg5[%c0_8, %c3, %c0_9] : memref<2x22x32xf32, #tpu.memory_space<vmem>>, vector<2x16x32xf32>
    tpu.vector_store %arg5[%c0_8, %c3, %c0_9], %0 {strides = array<i32>} : memref<2x22x32xf32, #tpu.memory_space<vmem>>, vector<2x16x32xf32>,
    %c0_10 = arith.constant 0 : index
    %c0_11 = arith.constant 0 : index
    %c0_12 = arith.constant 0 : index
    %6 = vector.load %arg5[%c0_10, %c0_11, %c0_12] : memref<2x22x32xf32, #tpu.memory_space<vmem>>, vector<2x16x32xf32>
    %c0_13 = arith.constant 0 : index
    %c0_14 = arith.constant 0 : index
    %c0_15 = arith.constant 0 : index
    %7 = vector.load %arg6[%c0_13, %c0_14, %c0_15] : memref<2x16x256xf32, #tpu.memory_space<vmem>>, vector<2x16x32xf32>
    tpu.vector_store %arg6[%c0_13, %c0_14, %c0_15], %6 {strides = array<i32>} : memref<2x16x256xf32, #tpu.memory_space<vmem>>, vector<2x16x32xf32>,
    %c0_16 = arith.constant 0 : index
    %c1 = arith.constant 1 : index
    %c0_17 = arith.constant 0 : index
    %8 = vector.load %arg5[%c0_16, %c1, %c0_17] : memref<2x22x32xf32, #tpu.memory_space<vmem>>, vector<2x16x32xf32>
    %c0_18 = arith.constant 0 : index
    %c0_19 = arith.constant 0 : index
    %c32 = arith.constant 32 : index
    %9 = vector.load %arg6[%c0_18, %c0_19, %c32] : memref<2x16x256xf32, #tpu.memory_space<vmem>>, vector<2x16x32xf32>
    tpu.vector_store %arg6[%c0_18, %c0_19, %c32], %8 {strides = array<i32>} : memref<2x16x256xf32, #tpu.memory_space<vmem>>, vector<2x16x32xf32>,
    %c0_20 = arith.constant 0 : index
    %c2 = arith.constant 2 : index
    %c0_21 = arith.constant 0 : index
    %10 = vector.load %arg5[%c0_20, %c2, %c0_21] : memref<2x22x32xf32, #tpu.memory_space<vmem>>, vector<2x16x32xf32>
    %c0_22 = arith.constant 0 : index
    %c0_23 = arith.constant 0 : index
    %c64 = arith.constant 64 : index
    %11 = vector.load %arg6[%c0_22, %c0_23, %c64] : memref<2x16x256xf32, #tpu.memory_space<vmem>>, vector<2x16x32xf32>
    tpu.vector_store %arg6[%c0_22, %c0_23, %c64], %10 {strides = array<i32>} : memref<2x16x256xf32, #tpu.memory_space<vmem>>, vector<2x16x32xf32>,
    %c0_24 = arith.constant 0 : index
    %c3_25 = arith.constant 3 : index
    %c0_26 = arith.constant 0 : index
    %12 = vector.load %arg5[%c0_24, %c3_25, %c0_26] : memref<2x22x32xf32, #tpu.memory_space<vmem>>, vector<2x16x32xf32>
    %c0_27 = arith.constant 0 : index
    %c0_28 = arith.constant 0 : index
    %c96 = arith.constant 96 : index
    %13 = vector.load %arg6[%c0_27, %c0_28, %c96] : memref<2x16x256xf32, #tpu.memory_space<vmem>>, vector<2x16x32xf32>
    tpu.vector_store %arg6[%c0_27, %c0_28, %c96], %12 {strides = array<i32>} : memref<2x16x256xf32, #tpu.memory_space<vmem>>, vector<2x16x32xf32>,
    %c0_29 = arith.constant 0 : index
    %c4 = arith.constant 4 : index
    %c0_30 = arith.constant 0 : index
    %14 = vector.load %arg5[%c0_29, %c4, %c0_30] : memref<2x22x32xf32, #tpu.memory_space<vmem>>, vector<2x16x32xf32>
    %c0_31 = arith.constant 0 : index
    %c0_32 = arith.constant 0 : index
    %c128 = arith.constant 128 : index
    %15 = vector.load %arg6[%c0_31, %c0_32, %c128] : memref<2x16x256xf32, #tpu.memory_space<vmem>>, vector<2x16x32xf32>
    tpu.vector_store %arg6[%c0_31, %c0_32, %c128], %14 {strides = array<i32>} : memref<2x16x256xf32, #tpu.memory_space<vmem>>, vector<2x16x32xf32>,
    %c0_33 = arith.constant 0 : index
    %c5 = arith.constant 5 : index
    %c0_34 = arith.constant 0 : index
    %16 = vector.load %arg5[%c0_33, %c5, %c0_34] : memref<2x22x32xf32, #tpu.memory_space<vmem>>, vector<2x16x32xf32>
    %c0_35 = arith.constant 0 : index
    %c0_36 = arith.constant 0 : index
    %c160 = arith.constant 160 : index
    %17 = vector.load %arg6[%c0_35, %c0_36, %c160] : memref<2x16x256xf32, #tpu.memory_space<vmem>>, vector<2x16x32xf32>
    tpu.vector_store %arg6[%c0_35, %c0_36, %c160], %16 {strides = array<i32>} : memref<2x16x256xf32, #tpu.memory_space<vmem>>, vector<2x16x32xf32>,
    %c0_37 = arith.constant 0 : index
    %c6 = arith.constant 6 : index
    %c0_38 = arith.constant 0 : index
    %18 = vector.load %arg5[%c0_37, %c6, %c0_38] : memref<2x22x32xf32, #tpu.memory_space<vmem>>, vector<2x16x32xf32>
    %c0_39 = arith.constant 0 : index
    %c0_40 = arith.constant 0 : index
    %c192 = arith.constant 192 : index
    %19 = vector.load %arg6[%c0_39, %c0_40, %c192] : memref<2x16x256xf32, #tpu.memory_space<vmem>>, vector<2x16x32xf32>
    tpu.vector_store %arg6[%c0_39, %c0_40, %c192], %18 {strides = array<i32>} : memref<2x16x256xf32, #tpu.memory_space<vmem>>, vector<2x16x32xf32>,
    %cst_41 = arith.constant 0.000000e+00 : f32
    %20 = vector.broadcast %cst_41 : f32 to vector<2x16x32xf32>
    %c0_42 = arith.constant 0 : index
    %c0_43 = arith.constant 0 : index
    %c224 = arith.constant 224 : index
    %21 = vector.load %arg6[%c0_42, %c0_43, %c224] : memref<2x16x256xf32, #tpu.memory_space<vmem>>, vector<2x16x32xf32>
    tpu.vector_store %arg6[%c0_42, %c0_43, %c224], %20 {strides = array<i32>} : memref<2x16x256xf32, #tpu.memory_space<vmem>>, vector<2x16x32xf32>,
    %c0_44 = arith.constant 0 : index
    %c0_45 = arith.constant 0 : index
    %c0_46 = arith.constant 0 : index
    %22 = vector.load %arg6[%c0_44, %c0_45, %c0_46] : memref<2x16x256xf32, #tpu.memory_space<vmem>>, vector<2x16x256xf32>
    %23 = vector.shape_cast %22 : vector<2x16x256xf32> to vector<32x256xf32>
    %24 = arith.truncf %23 : vector<32x256xf32> to vector<32x256xbf16>
    %c0_47 = arith.constant 0 : index
    %c0_48 = arith.constant 0 : index
    %25 = vector.load %arg2[%c0_47, %c0_48] : memref<256x32xbf16, #tpu.memory_space<vmem>>, vector<256x32xbf16>
    %cst_49 = arith.constant dense<0.000000e+00> : vector<32x32xf32>
    %26 = tpu.matmul %24, %25, %cst_49 {dimension_numbers = #tpu.dot_dimension_numbers<[1], [0], [0], [1], [0, 0, 1, 1], [], []>} : vector<32x256xbf16>, vector<256x32xbf16>, vector<32x32xf32> -> vector<32x32xf32>
    %27 = vector.shape_cast %26 : vector<32x32xf32> to vector<2x16x32xf32>
    %cst_50 = arith.constant dense<0.000000e+00> : vector<2x32xf32>
    %28 = vector.multi_reduction <add>, %27, %cst_50 [1] : vector<2x16x32xf32> to vector<2x32xf32>
    %29 = vector.shape_cast %28 : vector<2x32xf32> to vector<2x1x32xf32>
    %cst_51 = arith.constant 1.600000e+01 : f32
    %30 = vector.broadcast %cst_51 : f32 to vector<2x1x32xf32>
    %31 = arith.divf %29, %30 : vector<2x1x32xf32>
    %32 = vector.broadcast %31 : vector<2x1x32xf32> to vector<2x16x32xf32>
    %33 = arith.subf %27, %32 : vector<2x16x32xf32>
    %34 = arith.mulf %33, %33 : vector<2x16x32xf32>
    %cst_52 = arith.constant dense<0.000000e+00> : vector<2x32xf32>
    %35 = vector.multi_reduction <add>, %34, %cst_52 [1] : vector<2x16x32xf32> to vector<2x32xf32>
    %36 = vector.shape_cast %35 : vector<2x32xf32> to vector<2x1x32xf32>
    %cst_53 = arith.constant 1.600000e+01 : f32
    %37 = vector.broadcast %cst_53 : f32 to vector<2x1x32xf32>
    %38 = arith.divf %36, %37 : vector<2x1x32xf32>
    %cst_54 = arith.constant 9.99999974E-6 : f32
    %39 = vector.broadcast %cst_54 : f32 to vector<2x1x32xf32>
    %40 = arith.addf %38, %39 : vector<2x1x32xf32>
    %41 = math.rsqrt %40 : vector<2x1x32xf32>
    %42 = vector.broadcast %41 : vector<2x1x32xf32> to vector<2x16x32xf32>
    %43 = arith.mulf %33, %42 : vector<2x16x32xf32>
    %cst_55 = arith.constant 0.000000e+00 : f32
    %44 = vector.broadcast %cst_55 : f32 to vector<2x16x32xf32>
    %45 = arith.maximumf %43, %44 : vector<2x16x32xf32>
    %cst_56 = arith.constant 0.000000e+00 : f32
    %46 = vector.broadcast %cst_56 : f32 to vector<2x3x32xf32>
    %c0_57 = arith.constant 0 : index
    %c0_58 = arith.constant 0 : index
    %c0_59 = arith.constant 0 : index
    %47 = vector.load %arg7[%c0_57, %c0_58, %c0_59] : memref<2x22x32xf32, #tpu.memory_space<vmem>>, vector<2x3x32xf32>
    tpu.vector_store %arg7[%c0_57, %c0_58, %c0_59], %46 {strides = array<i32>} : memref<2x22x32xf32, #tpu.memory_space<vmem>>, vector<2x3x32xf32>,
    %cst_60 = arith.constant 0.000000e+00 : f32
    %48 = vector.broadcast %cst_60 : f32 to vector<2x3x32xf32>
    %c0_61 = arith.constant 0 : index
    %c19_62 = arith.constant 19 : index
    %c0_63 = arith.constant 0 : index
    %49 = vector.load %arg7[%c0_61, %c19_62, %c0_63] : memref<2x22x32xf32, #tpu.memory_space<vmem>>, vector<2x3x32xf32>
    tpu.vector_store %arg7[%c0_61, %c19_62, %c0_63], %48 {strides = array<i32>} : memref<2x22x32xf32, #tpu.memory_space<vmem>>, vector<2x3x32xf32>,
    %c0_64 = arith.constant 0 : index
    %c3_65 = arith.constant 3 : index
    %c0_66 = arith.constant 0 : index
    %50 = vector.load %arg7[%c0_64, %c3_65, %c0_66] : memref<2x22x32xf32, #tpu.memory_space<vmem>>, vector<2x16x32xf32>
    tpu.vector_store %arg7[%c0_64, %c3_65, %c0_66], %45 {strides = array<i32>} : memref<2x22x32xf32, #tpu.memory_space<vmem>>, vector<2x16x32xf32>,
    %c0_67 = arith.constant 0 : index
    %c0_68 = arith.constant 0 : index
    %c0_69 = arith.constant 0 : index
    %51 = vector.load %arg7[%c0_67, %c0_68, %c0_69] : memref<2x22x32xf32, #tpu.memory_space<vmem>>, vector<2x16x32xf32>
    %c0_70 = arith.constant 0 : index
    %c0_71 = arith.constant 0 : index
    %c0_72 = arith.constant 0 : index
    %52 = vector.load %arg8[%c0_70, %c0_71, %c0_72] : memref<2x16x256xf32, #tpu.memory_space<vmem>>, vector<2x16x32xf32>
    tpu.vector_store %arg8[%c0_70, %c0_71, %c0_72], %51 {strides = array<i32>} : memref<2x16x256xf32, #tpu.memory_space<vmem>>, vector<2x16x32xf32>,
    %c0_73 = arith.constant 0 : index
    %c1_74 = arith.constant 1 : index
    %c0_75 = arith.constant 0 : index
    %53 = vector.load %arg7[%c0_73, %c1_74, %c0_75] : memref<2x22x32xf32, #tpu.memory_space<vmem>>, vector<2x16x32xf32>
    %c0_76 = arith.constant 0 : index
    %c0_77 = arith.constant 0 : index
    %c32_78 = arith.constant 32 : index
    %54 = vector.load %arg8[%c0_76, %c0_77, %c32_78] : memref<2x16x256xf32, #tpu.memory_space<vmem>>, vector<2x16x32xf32>
    tpu.vector_store %arg8[%c0_76, %c0_77, %c32_78], %53 {strides = array<i32>} : memref<2x16x256xf32, #tpu.memory_space<vmem>>, vector<2x16x32xf32>,
    %c0_79 = arith.constant 0 : index
    %c2_80 = arith.constant 2 : index
    %c0_81 = arith.constant 0 : index
    %55 = vector.load %arg7[%c0_79, %c2_80, %c0_81] : memref<2x22x32xf32, #tpu.memory_space<vmem>>, vector<2x16x32xf32>
    %c0_82 = arith.constant 0 : index
    %c0_83 = arith.constant 0 : index
    %c64_84 = arith.constant 64 : index
    %56 = vector.load %arg8[%c0_82, %c0_83, %c64_84] : memref<2x16x256xf32, #tpu.memory_space<vmem>>, vector<2x16x32xf32>
    tpu.vector_store %arg8[%c0_82, %c0_83, %c64_84], %55 {strides = array<i32>} : memref<2x16x256xf32, #tpu.memory_space<vmem>>, vector<2x16x32xf32>,
    %c0_85 = arith.constant 0 : index
    %c3_86 = arith.constant 3 : index
    %c0_87 = arith.constant 0 : index
    %57 = vector.load %arg7[%c0_85, %c3_86, %c0_87] : memref<2x22x32xf32, #tpu.memory_space<vmem>>, vector<2x16x32xf32>
    %c0_88 = arith.constant 0 : index
    %c0_89 = arith.constant 0 : index
    %c96_90 = arith.constant 96 : index
    %58 = vector.load %arg8[%c0_88, %c0_89, %c96_90] : memref<2x16x256xf32, #tpu.memory_space<vmem>>, vector<2x16x32xf32>
    tpu.vector_store %arg8[%c0_88, %c0_89, %c96_90], %57 {strides = array<i32>} : memref<2x16x256xf32, #tpu.memory_space<vmem>>, vector<2x16x32xf32>,
    %c0_91 = arith.constant 0 : index
    %c4_92 = arith.constant 4 : index
    %c0_93 = arith.constant 0 : index
    %59 = vector.load %arg7[%c0_91, %c4_92, %c0_93] : memref<2x22x32xf32, #tpu.memory_space<vmem>>, vector<2x16x32xf32>
    %c0_94 = arith.constant 0 : index
    %c0_95 = arith.constant 0 : index
    %c128_96 = arith.constant 128 : index
    %60 = vector.load %arg8[%c0_94, %c0_95, %c128_96] : memref<2x16x256xf32, #tpu.memory_space<vmem>>, vector<2x16x32xf32>
    tpu.vector_store %arg8[%c0_94, %c0_95, %c128_96], %59 {strides = array<i32>} : memref<2x16x256xf32, #tpu.memory_space<vmem>>, vector<2x16x32xf32>,
    %c0_97 = arith.constant 0 : index
    %c5_98 = arith.constant 5 : index
    %c0_99 = arith.constant 0 : index
    %61 = vector.load %arg7[%c0_97, %c5_98, %c0_99] : memref<2x22x32xf32, #tpu.memory_space<vmem>>, vector<2x16x32xf32>
    %c0_100 = arith.constant 0 : index
    %c0_101 = arith.constant 0 : index
    %c160_102 = arith.constant 160 : index
    %62 = vector.load %arg8[%c0_100, %c0_101, %c160_102] : memref<2x16x256xf32, #tpu.memory_space<vmem>>, vector<2x16x32xf32>
    tpu.vector_store %arg8[%c0_100, %c0_101, %c160_102], %61 {strides = array<i32>} : memref<2x16x256xf32, #tpu.memory_space<vmem>>, vector<2x16x32xf32>,
    %c0_103 = arith.constant 0 : index
    %c6_104 = arith.constant 6 : index
    %c0_105 = arith.constant 0 : index
    %63 = vector.load %arg7[%c0_103, %c6_104, %c0_105] : memref<2x22x32xf32, #tpu.memory_space<vmem>>, vector<2x16x32xf32>
    %c0_106 = arith.constant 0 : index
    %c0_107 = arith.constant 0 : index
    %c192_108 = arith.constant 192 : index
    %64 = vector.load %arg8[%c0_106, %c0_107, %c192_108] : memref<2x16x256xf32, #tpu.memory_space<vmem>>, vector<2x16x32xf32>
    tpu.vector_store %arg8[%c0_106, %c0_107, %c192_108], %63 {strides = array<i32>} : memref<2x16x256xf32, #tpu.memory_space<vmem>>, vector<2x16x32xf32>,
    %cst_109 = arith.constant 0.000000e+00 : f32
    %65 = vector.broadcast %cst_109 : f32 to vector<2x16x32xf32>
    %c0_110 = arith.constant 0 : index
    %c0_111 = arith.constant 0 : index
    %c224_112 = arith.constant 224 : index
    %66 = vector.load %arg8[%c0_110, %c0_111, %c224_112] : memref<2x16x256xf32, #tpu.memory_space<vmem>>, vector<2x16x32xf32>
    tpu.vector_store %arg8[%c0_110, %c0_111, %c224_112], %65 {strides = array<i32>} : memref<2x16x256xf32, #tpu.memory_space<vmem>>, vector<2x16x32xf32>,
    %c0_113 = arith.constant 0 : index
    %c0_114 = arith.constant 0 : index
    %c0_115 = arith.constant 0 : index
    %67 = vector.load %arg8[%c0_113, %c0_114, %c0_115] : memref<2x16x256xf32, #tpu.memory_space<vmem>>, vector<2x16x256xf32>
    %68 = vector.shape_cast %67 : vector<2x16x256xf32> to vector<32x256xf32>
    %69 = arith.truncf %68 : vector<32x256xf32> to vector<32x256xbf16>
    %c0_116 = arith.constant 0 : index
    %c0_117 = arith.constant 0 : index
    %70 = vector.load %arg3[%c0_116, %c0_117] : memref<256x32xbf16, #tpu.memory_space<vmem>>, vector<256x32xbf16>
    %cst_118 = arith.constant dense<0.000000e+00> : vector<32x32xf32>
    %71 = tpu.matmul %69, %70, %cst_118 {dimension_numbers = #tpu.dot_dimension_numbers<[1], [0], [0], [1], [0, 0, 1, 1], [], []>} : vector<32x256xbf16>, vector<256x32xbf16>, vector<32x32xf32> -> vector<32x32xf32>
    %72 = vector.shape_cast %71 : vector<32x32xf32> to vector<2x16x32xf32>
    %cst_119 = arith.constant dense<0.000000e+00> : vector<2x32xf32>
    %73 = vector.multi_reduction <add>, %72, %cst_119 [1] : vector<2x16x32xf32> to vector<2x32xf32>
    %74 = vector.shape_cast %73 : vector<2x32xf32> to vector<2x1x32xf32>
    %cst_120 = arith.constant 1.600000e+01 : f32
    %75 = vector.broadcast %cst_120 : f32 to vector<2x1x32xf32>
    %76 = arith.divf %74, %75 : vector<2x1x32xf32>
    %77 = vector.broadcast %76 : vector<2x1x32xf32> to vector<2x16x32xf32>
    %78 = arith.subf %72, %77 : vector<2x16x32xf32>
    %79 = arith.mulf %78, %78 : vector<2x16x32xf32>
    %cst_121 = arith.constant dense<0.000000e+00> : vector<2x32xf32>
    %80 = vector.multi_reduction <add>, %79, %cst_121 [1] : vector<2x16x32xf32> to vector<2x32xf32>
    %81 = vector.shape_cast %80 : vector<2x32xf32> to vector<2x1x32xf32>
    %cst_122 = arith.constant 1.600000e+01 : f32
    %82 = vector.broadcast %cst_122 : f32 to vector<2x1x32xf32>
    %83 = arith.divf %81, %82 : vector<2x1x32xf32>
    %cst_123 = arith.constant 9.99999974E-6 : f32
    %84 = vector.broadcast %cst_123 : f32 to vector<2x1x32xf32>
    %85 = arith.addf %83, %84 : vector<2x1x32xf32>
    %86 = math.rsqrt %85 : vector<2x1x32xf32>
    %87 = vector.broadcast %86 : vector<2x1x32xf32> to vector<2x16x32xf32>
    %88 = arith.mulf %78, %87 : vector<2x16x32xf32>
    %89 = arith.addf %88, %0 : vector<2x16x32xf32>
    %cst_124 = arith.constant 0.000000e+00 : f32
    %90 = vector.broadcast %cst_124 : f32 to vector<2x16x32xf32>
    %91 = arith.maximumf %89, %90 : vector<2x16x32xf32>
    %c0_125 = arith.constant 0 : index
    %c0_126 = arith.constant 0 : index
    %c0_127 = arith.constant 0 : index
    %92 = vector.load %arg4[%c0_125, %c0_126, %c0_127] : memref<2x16x32xf32, #tpu.memory_space<vmem>>, vector<2x16x32xf32>
    tpu.vector_store %arg4[%c0_125, %c0_126, %c0_127], %91 {strides = array<i32>} : memref<2x16x32xf32, #tpu.memory_space<vmem>>, vector<2x16x32xf32>,
    return
  }
  func.func @transform_0(%arg0: i32) -> (i32, i32, i32) {
    %c0_i32 = arith.constant 0 : i32
    %c0_i32_0 = arith.constant 0 : i32
    %c0_i32_1 = arith.constant 0 : i32
    return %arg0, %c0_i32, %c0_i32_0 : i32, i32, i32
  }
  func.func @transform_1(%arg0: i32) -> (i32, i32) {
    %c0_i32 = arith.constant 0 : i32
    %c0_i32_0 = arith.constant 0 : i32
    %c0_i32_1 = arith.constant 0 : i32
    return %c0_i32, %c0_i32_0 : i32, i32
  }
  func.func @transform_2(%arg0: i32) -> (i32, i32) {
    %c0_i32 = arith.constant 0 : i32
    %c0_i32_0 = arith.constant 0 : i32
    %c0_i32_1 = arith.constant 0 : i32
    return %c0_i32, %c0_i32_0 : i32, i32
  }
  func.func @transform_3(%arg0: i32) -> (i32, i32, i32) {
    %c0_i32 = arith.constant 0 : i32
    %c0_i32_0 = arith.constant 0 : i32
    %c0_i32_1 = arith.constant 0 : i32
    return %arg0, %c0_i32, %c0_i32_0 : i32, i32, i32
  }
}

</mosaic_0001>

<bundles_post_ra>
// kernel: tpu_custom_call.1
= control target key start
LH: loop header
LB: loop body
LE: loop exit
PB: predicated region body
PF: predicated region fallthrough
CT: control target
= control target key end

     0   :  { %vm25_vm0 = vcmask 261120   ;;  %vm20_vm1 = vcmask 256000   ;;  %v1003_v2 = vmov 0.0   ;;  %s1004_s29 = smov 32   ;;  %s1005_s7 = smov 64   ;;  %s1324_s0 = inlined_call_operand.vmem [shape: f32[2,16,32], index: 0, kind: input, shape index: {}]   ;;  %s1325_s1 = inlined_call_operand.vmem [shape: bf16[256,32], index: 1, kind: input, shape index: {}]   ;;  %s1326_s2 = inlined_call_operand.vmem [shape: bf16[256,32], index: 2, kind: input, shape index: {}]   ;;  %s1327_s3 = inlined_call_operand.hbm [shape: f32[2,16,32], index: 3, kind: output, shape index: {}]  }
   0x1   :  { %v1033_v0 = vld [vmem:[%s1324_s0] sm:$0xff]  ;;  %v1038_v1 = vld [vmem:[%s1324_s0 + $0x8] sm:$0xff]  ;;  %21 = vst.msk [vmem:[#allocation2] sm:$0x7] %vm20_vm1, %v1003_v2  ;;  %22 = vst.msk [vmem:[#allocation2 + $0x18] sm:$0x7] %vm20_vm1, %v1003_v2 }
   0x2   :  { %26 = vst.msk [vmem:[#allocation2 + $0x3] sm:$0xff] %vm25_vm0, %v1033_v0  ;;  %27 = vst.msk [vmem:[#allocation2 + $0xb] sm:$0xff] %vm25_vm0, %v1038_v1  ;;  %v1055_v3 = vld [vmem:[%s1324_s0 + $0x10] sm:$0xff]  ;;  %v1060_v4 = vld [vmem:[%s1324_s0 + $0x18] sm:$0xff]  ;;  %s1006_s20 = smov 96  }
   0x3   :  { %23 = vst.msk [vmem:[#allocation2 + $0x13] sm:$0x7] %vm20_vm1, %v1003_v2  ;;  %24 = vst.msk [vmem:[#allocation2 + $0x2b] sm:$0x7] %vm20_vm1, %v1003_v2  ;;  %v939_v5 = vld [vmem:[%s1325_s1 + $0x40] sm:$0xff]   ;;  %v941_v7 = vld [vmem:[%s1325_s1 + $0x48] sm:$0xff]  }
   0x4   :  { %423 = vst.msk [vmem:[#allocation4] sm:$0x7] %vm20_vm1, %v1003_v2  ;;  %424 = vst.msk [vmem:[#allocation4 + $0x18] sm:$0x7] %vm20_vm1, %v1003_v2  ;;  %v940_v6 = vld [vmem:[%s1325_s1] sm:$0xff]   ;;  %876 = vmatprep.subr.bf16.mxu0 %v939_v5  ;;  %v942_v8 = vld [vmem:[%s1325_s1 + $0x8] sm:$0xff]  }
   0x5   :  { %425 = vst.msk [vmem:[#allocation4 + $0x13] sm:$0x7] %vm20_vm1, %v1003_v2  ;;  %426 = vst.msk [vmem:[#allocation4 + $0x2b] sm:$0x7] %vm20_vm1, %v1003_v2  ;;  %877 = vmatpush3.bf16.msra.mxu0 %v940_v6  ;;  %v943_v9 = vld [vmem:[%s1325_s1 + $0x50] sm:$0xff]   ;;  %v945_v23 = vld [vmem:[%s1325_s1 + $0x58] sm:$0xff]  }
   0x6   :  { %28 = vst.msk [vmem:[#allocation2 + $0x1b] sm:$0xff] %vm25_vm0, %v1055_v3  ;;  %29 = vst.msk [vmem:[#allocation2 + $0x23] sm:$0xff] %vm25_vm0, %v1060_v4  ;;  %878 = vmatprep.subr.bf16.mxu0 %v941_v7  ;;  %v944_v14 = vld [vmem:[%s1325_s1 + $0x10] sm:$0xff]   ;;  %v946_v24 = vld [vmem:[%s1325_s1 + $0x18] sm:$0xff]  }
   0x7   :  { %v947_v26 = vld [vmem:[%s1325_s1 + $0x60] sm:$0xff]   ;;  %v949_v29 = vld [vmem:[%s1325_s1 + $0x68] sm:$0xff]   ;;  %v951_v35 = vld [vmem:[%s1325_s1 + $0x70] sm:$0xff]  }
   0x8   :  { %v948_v27 = vld [vmem:[%s1325_s1 + $0x20] sm:$0xff]   ;;  %v950_v32 = vld [vmem:[%s1325_s1 + $0x28] sm:$0xff]   ;;  %v952_v36 = vld [vmem:[%s1325_s1 + $0x30] sm:$0xff]  }
   0x9   :  { %v121_v10 = vld [vmem:[#allocation2 + $0x5] sm:$0xff]  ;;  %879 = vmatpush3.bf16.msra.mxu0 %v942_v8  ;;  %v953_v38 = vld [vmem:[%s1325_s1 + $0x78] sm:$0xff]  }
   0xa   :  { %v38_v11 = vld [vmem:[#allocation2 + $0x1] sm:$0xff]  ;;  %129 = vrot.lane.b32.xlu0 %v121_v10, %s1004_s29  ;;  %v122_v12 = vld [vmem:[#allocation2 + $0xd] sm:$0xff]  ;;  %880 = vmatprep.subr.bf16.mxu0 %v943_v9  ;;  %v954_v42 = vld [vmem:[%s1325_s1 + $0x38] sm:$0xff]  }
   0xb   :  { %46 = vrot.lane.b32.xlu1 %v38_v11, %s1004_s29  ;;  %v39_v13 = vld [vmem:[#allocation2 + $0x9] sm:$0xff]  ;;  %v30_v18 = vld [vmem:[#allocation2] sm:$0xff] }
   0xc   :  { %v145_v15 = vld [vmem:[#allocation2 + $0x6] sm:$0xff]  ;;  %v146_v16 = vld [vmem:[#allocation2 + $0xe] sm:$0xff]  ;;  %34 = vst.msk [vmem:[#allocation3] sm:$0xff] %vm25_vm0, %v30_v18 }
   0xd   :  { %v113_v17 = vld [vmem:[#allocation2 + $0x4] sm:$0xff]  ;;  %881 = vmatpush3.bf16.msra.mxu0 %v944_v14  ;;  %v114_v19 = vld [vmem:[#allocation2 + $0xc] sm:$0xff]  ;;  %v115_v25 = vld [vmem:[#allocation2 + $0x1c] sm:$0xff] }
   0xe   :  { %131 = vrot.lane.b32.xlu0 %v122_v12, %s1004_s29  ;;  %117 = vst.msk [vmem:[#allocation3 + $0x8] sm:$0xff] %vm25_vm0, %v113_v17  ;;  %v31_v20 = vld [vmem:[#allocation2 + $0x8] sm:$0xff]  ;;  %118 = vst.msk [vmem:[#allocation3 + $0x18] sm:$0xff] %vm25_vm0, %v114_v19  ;;  %882 = vmatprep.subr.bf16.mxu0 %v945_v23  ;;  %v123_v33 = vld [vmem:[#allocation2 + $0x1d] sm:$0xff] }
   0xf   :  { %48 = vrot.lane.b32.xlu1 %v39_v13, %s1004_s29  ;;  %v63_v21 = vld [vmem:[#allocation2 + $0x2] sm:$0xff]  ;;  %v64_v22 = vld [vmem:[#allocation2 + $0xa] sm:$0xff]  ;;  %35 = vst.msk [vmem:[#allocation3 + $0x10] sm:$0xff] %vm25_vm0, %v31_v20  ;;  %119 = vst.msk [vmem:[#allocation3 + $0x28] sm:$0xff] %vm25_vm0, %v115_v25 }
  0x10   :  { %v88_v28 = vld [vmem:[#allocation2 + $0x3] sm:$0xff]  ;;  %v89_v31 = vld [vmem:[#allocation2 + $0xb] sm:$0xff]  ;;  %v32_v37 = vld [vmem:[#allocation2 + $0x18] sm:$0xff] }
  0x11   :  { %883 = vmatpush3.bf16.msra.mxu0 %v946_v24  ;;  %v116_v30 = vld [vmem:[#allocation2 + $0x24] sm:$0xff]  ;;  %36 = vst.msk [vmem:[#allocation3 + $0x20] sm:$0xff] %vm25_vm0, %v32_v37  ;;  %v40_v40 = vld [vmem:[#allocation2 + $0x19] sm:$0xff] }
  0x12   :  { %153 = vrot.lane.b32.xlu0 %v145_v15, %s1005_s7  ;;  %884 = vmatprep.subr.bf16.mxu0 %v947_v26  ;;  %120 = vst.msk [vmem:[#allocation3 + $0x38] sm:$0xff] %vm25_vm0, %v116_v30  ;;  %v124_v34 = vld [vmem:[#allocation2 + $0x25] sm:$0xff]  ;;  %v65_v45 = vld [vmem:[#allocation2 + $0x1a] sm:$0xff] }
  0x13   :  { %155 = vrot.lane.b32.xlu1 %v146_v16, %s1005_s7  ;;  %v33_v39 = vld [vmem:[#allocation2 + $0x20] sm:$0xff] }
  0x14   :  { %37 = vst.msk [vmem:[#allocation3 + $0x30] sm:$0xff] %vm25_vm0, %v33_v39  ;;  %v41_v41 = vld [vmem:[#allocation2 + $0x21] sm:$0xff] }
  0x15   :  { %885 = vmatpush3.bf16.msra.mxu0 %v948_v27  ;;  %v147_v43 = vld [vmem:[#allocation2 + $0x1e] sm:$0xff]  ;;  %v148_v44 = vld [vmem:[#allocation2 + $0x26] sm:$0xff] }
  0x16   :  { %71 = vrot.lane.b32.xlu0 %v63_v21, %s1005_s7  ;;  %886 = vmatprep.subr.bf16.mxu0 %v949_v29  ;;  %v66_v46 = vld [vmem:[#allocation2 + $0x22] sm:$0xff] }
  0x17   :  { %73 = vrot.lane.b32.xlu1 %v64_v22, %s1005_s7 }
  0x19   :  { %887 = vmatpush3.bf16.msra.mxu0 %v950_v32 }
  0x1a   :  { %96 = vrot.lane.b32.xlu0 %v88_v28, %s1006_s20  ;;  %888 = vmatprep.subr.bf16.mxu0 %v951_v35 }
  0x1b   :  { %98 = vrot.lane.b32.xlu1 %v89_v31, %s1006_s20 }
  0x1d   :  { %889 = vmatpush3.bf16.msra.mxu0 %v952_v36 }
  0x1e   :  { %133 = vrot.lane.b32.xlu0 %v123_v33, %s1004_s29  ;;  %890 = vmatprep.subr.bf16.mxu0 %v953_v38 }
  0x1f   :  { %135 = vrot.lane.b32.xlu1 %v124_v34, %s1004_s29 }
  0x21   :  { %891 = vmatpush3.bf16.msra.mxu0 %v954_v42 }
  0x22   :  { %50 = vrot.lane.b32.xlu0 %v40_v40, %s1004_s29 }
  0x23   :  { %52 = vrot.lane.b32.xlu1 %v41_v41, %s1004_s29 }
  0x26   :  { %157 = vrot.lane.b32.xlu0 %v147_v43, %s1005_s7 }
  0x27   :  { %159 = vrot.lane.b32.xlu1 %v148_v44, %s1005_s7 }
  0x28   :  { %8 = vsyncpa [#allocation7], 0  ;;  %v90_v47 = vld [vmem:[#allocation2 + $0x1b] sm:$0xff]  ;;  %v91_v48 = vld [vmem:[#allocation2 + $0x23] sm:$0xff]  ;;  %vm58_vm2 = vcmask 523520   ;;  %vm83_vm3 = vcmask 785920  }
  0x29   :  { %vm108_vm4 = vcmask 1048320   ;;  %v955_v22 = vld [vmem:[%s1326_s2 + $0x40] sm:$0xff]   ;;  %v957_v24 = vld [vmem:[%s1326_s2 + $0x48] sm:$0xff]  }
  0x2a   :  { %75 = vrot.lane.b32.xlu0 %v65_v45, %s1005_s7  ;;  %v956_v23 = vld [vmem:[%s1326_s2] sm:$0xff]   ;;  %904 = vmatprep.subr.bf16.mxu1 %v955_v22  ;;  %v958_v25 = vld [vmem:[%s1326_s2 + $0x8] sm:$0xff]  }
  0x2b   :  { %77 = vrot.lane.b32.xlu1 %v66_v46, %s1005_s7  ;;  %905 = vmatpush3.bf16.msra.mxu1 %v956_v23 }
  0x2c   :  { %906 = vmatprep.subr.bf16.mxu1 %v957_v24 }
  0x2e   :  { %100 = vrot.lane.b32.xlu0 %v90_v47, %s1006_s20 }
  0x2f   :  { %102 = vrot.lane.b32.xlu1 %v91_v48, %s1006_s20  ;;  %907 = vmatpush3.bf16.msra.mxu1 %v958_v25 }
  0x7c   :  { %v130_v49 = vpop.permute.xlu0 %129 }
  0x7d   :  { %v47_v50 = vpop.permute.xlu1 %46  ;;  %141 = vst.msk [vmem:[#allocation3 + $0x8] sm:$0xff] %vm58_vm2, %v130_v49 }
  0x7e   :  { %59 = vst.msk [vmem:[#allocation3] sm:$0xff] %vm58_vm2, %v47_v50 }
  0x80   :  { %v132_v51 = vpop.permute.xlu0 %131 }
  0x81   :  { %v49_v52 = vpop.permute.xlu1 %48  ;;  %142 = vst.msk [vmem:[#allocation3 + $0x18] sm:$0xff] %vm58_vm2, %v132_v51 }
  0x82   :  { %60 = vst.msk [vmem:[#allocation3 + $0x10] sm:$0xff] %vm58_vm2, %v49_v52 }
  0x84   :  { %v154_v53 = vpop.permute.xlu0 %153 }
  0x85   :  { %v156_v54 = vpop.permute.xlu1 %155  ;;  %165 = vst.msk [vmem:[#allocation3 + $0x8] sm:$0xff] %vm83_vm3, %v154_v53 }
  0x86   :  { %166 = vst.msk [vmem:[#allocation3 + $0x18] sm:$0xff] %vm83_vm3, %v156_v54 }
  0x87   :  { %169 = vst.msk [vmem:[#allocation3 + $0x8] sm:$0xff] %vm108_vm4, %v1003_v2  ;;  %170 = vst.msk [vmem:[#allocation3 + $0x18] sm:$0xff] %vm108_vm4, %v1003_v2 }
  0x88   :  { %v72_v55 = vpop.permute.xlu0 %71 }
  0x89   :  { %v74_v56 = vpop.permute.xlu1 %73  ;;  %84 = vst.msk [vmem:[#allocation3] sm:$0xff] %vm83_vm3, %v72_v55 }
  0x8a   :  { %85 = vst.msk [vmem:[#allocation3 + $0x10] sm:$0xff] %vm83_vm3, %v74_v56 }
  0x8c   :  { %v97_v57 = vpop.permute.xlu0 %96 }
  0x8d   :  { %v99_v58 = vpop.permute.xlu1 %98  ;;  %109 = vst.msk [vmem:[#allocation3] sm:$0xff] %vm108_vm4, %v97_v57 }
  0x8e   :  { %110 = vst.msk [vmem:[#allocation3 + $0x10] sm:$0xff] %vm108_vm4, %v99_v58  ;;  %v174_v59 = vld [vmem:[#allocation3 + $0x8] sm:$0xff]  ;;  %v176_v60 = vld [vmem:[#allocation3 + $0x18] sm:$0xff] }
  0x8f   :  { %v182_v61 = vpack.c.bf16 %v176_v60, %v174_v59 }
  0x90   :  { %v134_v62 = vpop.permute.xlu0 %133 }
  0x91   :  { %v136_v63 = vpop.permute.xlu1 %135  ;;  %345 = vmatprep.mubr.bf16.mxu0 %v182_v61  ;;  %143 = vst.msk [vmem:[#allocation3 + $0x28] sm:$0xff] %vm58_vm2, %v134_v62 }
  0x92   :  { %144 = vst.msk [vmem:[#allocation3 + $0x38] sm:$0xff] %vm58_vm2, %v136_v63 }
  0x94   :  { %v51_v5 = vpop.permute.xlu0 %50  ;;  %v173_v7 = vld [vmem:[#allocation3] sm:$0xff] }
  0x95   :  { %v53_v6 = vpop.permute.xlu1 %52  ;;  %v175_v8 = vld [vmem:[#allocation3 + $0x10] sm:$0xff]  ;;  %61 = vst.msk [vmem:[#allocation3 + $0x20] sm:$0xff] %vm58_vm2, %v51_v5 }
  0x96   :  { %62 = vst.msk [vmem:[#allocation3 + $0x30] sm:$0xff] %vm58_vm2, %v53_v6  ;;  %v181_v9 = vpack.c.bf16 %v175_v8, %v173_v7 }
  0x98   :  { %346 = vmatmul.mubr.bf16.vlgmr.msra.gmra.mrb[0].mxu0 %v181_v9  ;;  %v158_v10 = vpop.permute.xlu0 %157 }
  0x99   :  { %v160_v11 = vpop.permute.xlu1 %159  ;;  %167 = vst.msk [vmem:[#allocation3 + $0x28] sm:$0xff] %vm83_vm3, %v158_v10 }
  0x9a   :  { %168 = vst.msk [vmem:[#allocation3 + $0x38] sm:$0xff] %vm83_vm3, %v160_v11 }
  0x9b   :  { %171 = vst.msk [vmem:[#allocation3 + $0x28] sm:$0xff] %vm108_vm4, %v1003_v2  ;;  %172 = vst.msk [vmem:[#allocation3 + $0x38] sm:$0xff] %vm108_vm4, %v1003_v2 }
  0x9c   :  { %v76_v12 = vpop.permute.xlu0 %75 }
  0x9d   :  { %v78_v13 = vpop.permute.xlu1 %77  ;;  %86 = vst.msk [vmem:[#allocation3 + $0x20] sm:$0xff] %vm83_vm3, %v76_v12 }
  0x9e   :  { %87 = vst.msk [vmem:[#allocation3 + $0x30] sm:$0xff] %vm83_vm3, %v78_v13 }
  0xa0   :  { %v101_v14 = vpop.permute.xlu0 %100 }
  0xa1   :  { %v103_v15 = vpop.permute.xlu1 %102  ;;  %111 = vst.msk [vmem:[#allocation3 + $0x20] sm:$0xff] %vm108_vm4, %v101_v14 }
  0xa2   :  { %112 = vst.msk [vmem:[#allocation3 + $0x30] sm:$0xff] %vm108_vm4, %v103_v15  ;;  %v178_v16 = vld [vmem:[#allocation3 + $0x28] sm:$0xff]  ;;  %v180_v17 = vld [vmem:[#allocation3 + $0x38] sm:$0xff] }
  0xa3   :  { %v184_v18 = vpack.c.bf16 %v180_v17, %v178_v16 }
  0xa5   :  { %353 = vmatprep.mubr.bf16.mxu0 %v184_v18 }
  0xa8   :  { %v177_v19 = vld [vmem:[#allocation3 + $0x20] sm:$0xff] }
  0xa9   :  { %v179_v20 = vld [vmem:[#allocation3 + $0x30] sm:$0xff] }
  0xaa   :  { %v183_v21 = vpack.c.bf16 %v179_v20, %v177_v19 }
  0xac   :  { %354 = vmatmul.mubr.bf16.gmra.mrb[4].mxu0 %v183_v21 }
 0x16b   :  { %v892_v26 = vpop.f32.mrb[0].mxu0 }
 0x16c   :  { %v893_v27 = vpop.f32.mrb[1].mxu0 }
 0x16d   :  { %v894_v28 = vadd.f32 %v893_v27, %v892_v26  ;;  %v895_v29 = vpop.f32.mrb[2].mxu0  ;;  %v959_v26 = vld [vmem:[%s1326_s2 + $0x50] sm:$0xff]  }
 0x16e   :  { %v896_v30 = vpop.f32.mrb[3].mxu0  ;;  %v960_v27 = vld [vmem:[%s1326_s2 + $0x10] sm:$0xff]   ;;  %908 = vmatprep.subr.bf16.mxu1 %v959_v26 }
 0x16f   :  { %v897_v31 = vadd.f32 %v896_v30, %v895_v29  ;;  %v362_v32 = vsel %vm25_vm0, %v894_v28, 0.0  ;;  %909 = vmatpush3.bf16.msra.mxu1 %v960_v27 }
 0x171   :  { %v363_v33 = vsel %vm25_vm0, %v897_v31, 0.0 }
 0x172   :  { %v364_v34 = vadd.f32 %v363_v33, %v362_v32 }
 0x174   :  { %v365_v35 = vrot.slane %v364_v34, 4 }
 0x176   :  { %v366_v36 = vadd.f32 %v365_v35, %v364_v34  ;;  %v961_v34 = vld [vmem:[%s1326_s2 + $0x58] sm:$0xff]  }
 0x177   :  { %v962_v35 = vld [vmem:[%s1326_s2 + $0x18] sm:$0xff]   ;;  %910 = vmatprep.subr.bf16.mxu1 %v961_v34 }
 0x178   :  { %v367_v37 = vrot.slane %v366_v36, 2  ;;  %911 = vmatpush3.bf16.msra.mxu1 %v962_v35 }
 0x17a   :  { %v368_v38 = vadd.f32 %v367_v37, %v366_v36 }
 0x17c   :  { %v369_v39 = vrot.slane %v368_v38, 1 }
 0x17e   :  { %v370_v40 = vadd.f32 %v369_v39, %v368_v38  ;;  %v963_v38 = vld [vmem:[%s1326_s2 + $0x60] sm:$0xff]  }
 0x17f   :  { %v898_v41 = vpop.f32.mrb[4].mxu0  ;;  %v964_v39 = vld [vmem:[%s1326_s2 + $0x20] sm:$0xff]   ;;  %912 = vmatprep.subr.bf16.mxu1 %v963_v38 }
 0x180   :  { %v381_v42 = vmul.f32 0.0625, %v370_v40  ;;  %v899_v43 = vpop.f32.mrb[5].mxu0  ;;  %913 = vmatpush3.bf16.msra.mxu1 %v964_v39 }
 0x181   :  { %v900_v44 = vadd.f32 %v899_v43, %v898_v41  ;;  %v901_v45 = vpop.f32.mrb[6].mxu0 }
 0x182   :  { %v383_v46 = vsub.f32 %v894_v28, %v381_v42  ;;  %v384_v47 = vsub.f32 %v897_v31, %v381_v42  ;;  %v902_v48 = vpop.f32.mrb[7].mxu0 }
 0x183   :  { %v903_v49 = vadd.f32 %v902_v48, %v901_v45  ;;  %v371_v52 = vsel %vm25_vm0, %v900_v44, 0.0  ;;  %v965_v48 = vld [vmem:[%s1326_s2 + $0x68] sm:$0xff]  }
 0x184   :  { %v387_v50 = vmul.f32 %v383_v46, %v383_v46  ;;  %v388_v51 = vmul.f32 %v384_v47, %v384_v47  ;;  %914 = vmatprep.subr.bf16.mxu1 %v965_v48 }
 0x185   :  { %v372_v53 = vsel %vm25_vm0, %v903_v49, 0.0 }
 0x186   :  { %v391_v54 = vsel %vm25_vm0, %v387_v50, 0.0  ;;  %v392_v55 = vsel %vm25_vm0, %v388_v51, 0.0  ;;  %v373_v56 = vadd.f32 %v372_v53, %v371_v52  ;;  %v967_v50 = vld [vmem:[%s1326_s2 + $0x70] sm:$0xff]  }
 0x187   :  { %v393_v57 = vadd.f32 %v392_v55, %v391_v54  ;;  %v968_v51 = vld [vmem:[%s1326_s2 + $0x30] sm:$0xff]   ;;  %v969_v55 = vld [vmem:[%s1326_s2 + $0x78] sm:$0xff]  }
 0x188   :  { %v374_v58 = vrot.slane %v373_v56, 4 }
 0x189   :  { %v394_v59 = vrot.slane %v393_v57, 4 }
 0x18a   :  { %v375_v60 = vadd.f32 %v374_v58, %v373_v56 }
 0x18b   :  { %v395_v61 = vadd.f32 %v394_v59, %v393_v57 }
 0x18c   :  { %v376_v62 = vrot.slane %v375_v60, 2 }
 0x18d   :  { %v396_v63 = vrot.slane %v395_v61, 2 }
 0x18e   :  { %v377_v5 = vadd.f32 %v376_v62, %v375_v60  ;;  %v970_v60 = vld [vmem:[%s1326_s2 + $0x38] sm:$0xff]  }
 0x18f   :  { %v397_v6 = vadd.f32 %v396_v63, %v395_v61 }
 0x190   :  { %v378_v7 = vrot.slane %v377_v5, 1 }
 0x191   :  { %v398_v8 = vrot.slane %v397_v6, 1 }
 0x192   :  { %v379_v9 = vadd.f32 %v378_v7, %v377_v5 }
 0x193   :  { %v399_v10 = vadd.f32 %v398_v8, %v397_v6 }
 0x194   :  { %v382_v11 = vmul.f32 0.0625, %v379_v9 }
 0x195   :  { %v409_v12 = vmul.f32 0.0625, %v399_v10 }
 0x196   :  { %v1188_v13 = vsub.f32 %v900_v44, %v382_v11  ;;  %v1190_v14 = vsub.f32 %v903_v49, %v382_v11  ;;  %v966_v49 = vld [vmem:[%s1326_s2 + $0x28] sm:$0xff]   ;;  %s1007_s2 = smov [#allocation6]  }
 0x197   :  { %v411_v15 = vadd.f32 1e-05, %v409_v12  ;;  %915 = vmatpush3.bf16.msra.mxu1 %v966_v49 }
 0x198   :  { %v389_v16 = vmul.f32 %v1188_v13, %v1188_v13  ;;  %v390_v17 = vmul.f32 %v1190_v14, %v1190_v14  ;;  %916 = vmatprep.subr.bf16.mxu1 %v967_v50 }
 0x199   :  { %971 = vrsqrt.f32 %v411_v15 }
 0x19a   :  { %v400_v18 = vsel %vm25_vm0, %v389_v16, 0.0  ;;  %v401_v19 = vsel %vm25_vm0, %v390_v17, 0.0 }
 0x19b   :  { %v402_v20 = vadd.f32 %v401_v19, %v400_v18  ;;  %917 = vmatpush3.bf16.msra.mxu1 %v968_v51 }
 0x19c   :  { %918 = vmatprep.subr.bf16.mxu1 %v969_v55 }
 0x19d   :  { %v403_v21 = vrot.slane %v402_v20, 4 }
 0x19f   :  { %v404_v22 = vadd.f32 %v403_v21, %v402_v20  ;;  %919 = vmatpush3.bf16.msra.mxu1 %v970_v60 }
 0x1a1   :  { %v405_v23 = vrot.slane %v404_v22, 2 }
 0x1a3   :  { %v972_v24 = vpop.eup %971  ;;  %v406_v25 = vadd.f32 %v405_v23, %v404_v22 }
 0x1a4   :  { %v415_v28 = vmul.f32 %v972_v24, %v383_v46  ;;  %v416_v29 = vmul.f32 %v972_v24, %v384_v47 }
 0x1a5   :  { %v407_v30 = vrot.slane %v406_v25, 1 }
 0x1a6   :  { %v419_v31 = vmax.f32 %v415_v28, 0.0  ;;  %v420_v32 = vmax.f32 %v416_v29, 0.0 }
 0x1a7   :  { %v408_v33 = vadd.f32 %v407_v30, %v406_v25 }
 0x1a8   :  { %427 = vst.msk [vmem:[#allocation4 + $0x3] sm:$0xff] %vm25_vm0, %v419_v31  ;;  %428 = vst.msk [vmem:[#allocation4 + $0xb] sm:$0xff] %vm25_vm0, %v420_v32 }
 0x1a9   :  { %v410_v36 = vmul.f32 0.0625, %v408_v33 }
 0x1ab   :  { %v412_v37 = vadd.f32 1e-05, %v410_v36 }
 0x1ad   :  { %973 = vrsqrt.f32 %v412_v37 }
 0x1af   :  { %v520_v40 = vld [vmem:[#allocation4 + $0xd] sm:$0xff]  ;;  %v519_v41 = vld [vmem:[#allocation4 + $0x5] sm:$0xff] }
 0x1b0   :  { %529 = vrot.lane.b32.xlu1 %v520_v40, %s1004_s29  ;;  %527 = vrot.lane.b32.xlu0 %v519_v41, %s1004_s29  ;;  %v440_v42 = vld [vmem:[#allocation4 + $0x9] sm:$0xff]  ;;  %v439_v43 = vld [vmem:[#allocation4 + $0x1] sm:$0xff] }
 0x1b1   :  { %v512_v44 = vld [vmem:[#allocation4 + $0xc] sm:$0xff]  ;;  %v511_v45 = vld [vmem:[#allocation4 + $0x4] sm:$0xff] }
 0x1b2   :  { %516 = vst.msk [vmem:[#allocation5 + $0x18] sm:$0xff] %vm25_vm0, %v512_v44  ;;  %515 = vst.msk [vmem:[#allocation5 + $0x8] sm:$0xff] %vm25_vm0, %v511_v45  ;;  %v432_v46 = vld [vmem:[#allocation4 + $0x8] sm:$0xff]  ;;  %v431_v47 = vld [vmem:[#allocation4] sm:$0xff] }
 0x1b3   :  { %436 = vst.msk [vmem:[#allocation5 + $0x10] sm:$0xff] %vm25_vm0, %v432_v46  ;;  %435 = vst.msk [vmem:[#allocation5] sm:$0xff] %vm25_vm0, %v431_v47  ;;  %v544_v53 = vld [vmem:[#allocation4 + $0xe] sm:$0xff]  ;;  %v543_v54 = vld [vmem:[#allocation4 + $0x6] sm:$0xff] }
 0x1b4   :  { %449 = vrot.lane.b32.xlu1 %v440_v42, %s1004_s29  ;;  %447 = vrot.lane.b32.xlu0 %v439_v43, %s1004_s29  ;;  %v464_v61 = vld [vmem:[#allocation4 + $0xa] sm:$0xff]  ;;  %v463_v62 = vld [vmem:[#allocation4 + $0x2] sm:$0xff] }
 0x1b5   :  { %v488_v63 = vld [vmem:[#allocation4 + $0xb] sm:$0xff]  ;;  %v487_v5 = vld [vmem:[#allocation4 + $0x3] sm:$0xff] }
 0x1b7   :  { %v974_v52 = vpop.eup %973 }
 0x1b8   :  { %v417_v56 = vmul.f32 %v974_v52, %v1188_v13  ;;  %v418_v57 = vmul.f32 %v974_v52, %v1190_v14  ;;  %553 = vrot.lane.b32.xlu1 %v544_v53, %s1005_s7  ;;  %551 = vrot.lane.b32.xlu0 %v543_v54, %s1005_s7 }
 0x1ba   :  { %v421_v58 = vmax.f32 %v417_v56, 0.0  ;;  %v422_v59 = vmax.f32 %v418_v57, 0.0 }
 0x1bc   :  { %429 = vst.msk [vmem:[#allocation4 + $0x1b] sm:$0xff] %vm25_vm0, %v421_v58  ;;  %430 = vst.msk [vmem:[#allocation4 + $0x23] sm:$0xff] %vm25_vm0, %v422_v59  ;;  %473 = vrot.lane.b32.xlu1 %v464_v61, %s1005_s7  ;;  %471 = vrot.lane.b32.xlu0 %v463_v62, %s1005_s7 }
 0x1c0   :  { %497 = vrot.lane.b32.xlu1 %v488_v63, %s1006_s20  ;;  %495 = vrot.lane.b32.xlu0 %v487_v5, %s1006_s20 }
 0x1c3   :  { %v522_v6 = vld [vmem:[#allocation4 + $0x25] sm:$0xff]  ;;  %v521_v7 = vld [vmem:[#allocation4 + $0x1d] sm:$0xff] }
 0x1c4   :  { %533 = vrot.lane.b32.xlu1 %v522_v6, %s1004_s29  ;;  %531 = vrot.lane.b32.xlu0 %v521_v7, %s1004_s29  ;;  %v442_v8 = vld [vmem:[#allocation4 + $0x21] sm:$0xff]  ;;  %v441_v11 = vld [vmem:[#allocation4 + $0x19] sm:$0xff] }
 0x1c5   :  { %v514_v9 = vld [vmem:[#allocation4 + $0x24] sm:$0xff]  ;;  %v513_v10 = vld [vmem:[#allocation4 + $0x1c] sm:$0xff] }
 0x1c6   :  { %518 = vst.msk [vmem:[#allocation5 + $0x38] sm:$0xff] %vm25_vm0, %v514_v9  ;;  %517 = vst.msk [vmem:[#allocation5 + $0x28] sm:$0xff] %vm25_vm0, %v513_v10  ;;  %v434_v12 = vld [vmem:[#allocation4 + $0x20] sm:$0xff]  ;;  %v433_v13 = vld [vmem:[#allocation4 + $0x18] sm:$0xff] }
 0x1c7   :  { %438 = vst.msk [vmem:[#allocation5 + $0x30] sm:$0xff] %vm25_vm0, %v434_v12  ;;  %437 = vst.msk [vmem:[#allocation5 + $0x20] sm:$0xff] %vm25_vm0, %v433_v13  ;;  %v546_v14 = vld [vmem:[#allocation4 + $0x26] sm:$0xff]  ;;  %v545_v15 = vld [vmem:[#allocation4 + $0x1e] sm:$0xff] }
 0x1c8   :  { %453 = vrot.lane.b32.xlu1 %v442_v8, %s1004_s29  ;;  %451 = vrot.lane.b32.xlu0 %v441_v11, %s1004_s29  ;;  %v466_v16 = vld [vmem:[#allocation4 + $0x22] sm:$0xff]  ;;  %v465_v17 = vld [vmem:[#allocation4 + $0x1a] sm:$0xff]  ;;  %s833_s29 = sshll.u32 %s1007_s2, 4  ;;  %s834_s29 = int_to_ptr.vmem [resolvable:$true] %s833_s29 }
 0x1c9   :  { %v490_v18 = vld [vmem:[#allocation4 + $0x23] sm:$0xff]  ;;  %v489_v19 = vld [vmem:[#allocation4 + $0x1b] sm:$0xff]  ;;  %p984_p1 = scmp.lt.s32.totalorder %s834_s29, %s834_s29 }
 0x1cc   :  { %557 = vrot.lane.b32.xlu1 %v546_v14, %s1005_s7  ;;  %555 = vrot.lane.b32.xlu0 %v545_v15, %s1005_s7 }
 0x1d0   :  { %477 = vrot.lane.b32.xlu1 %v466_v16, %s1005_s7  ;;  %475 = vrot.lane.b32.xlu0 %v465_v17, %s1005_s7  ;;  %s979_s7 = scalar_lea.vmem %s834_s29, 512 }
 0x1d1   :  { %p980_p0 = scmp.ne.s32.totalorder %s834_s29, %s979_s7  ;;  %p985_p2 = scmp.lt.s32.totalorder %s979_s7, %s979_s7 }
 0x1d3   :  { %p986_p3 = por %p985_p2, %p984_p1 }
 0x1d4   :  { %501 = vrot.lane.b32.xlu1 %v490_v18, %s1006_s20  ;;  %499 = vrot.lane.b32.xlu0 %v489_v19, %s1006_s20 }
 0x1d5   :  { %p987_p4 = pnand %p986_p3, %p980_p0 }
 0x222   :  { %v530_v20 = vpop.permute.xlu1 %529  ;;  %v528_v21 = vpop.permute.xlu0 %527 }
 0x223   :  { %540 = vst.msk [vmem:[#allocation5 + $0x18] sm:$0xff] %vm58_vm2, %v530_v20  ;;  %539 = vst.msk [vmem:[#allocation5 + $0x8] sm:$0xff] %vm58_vm2, %v528_v21 }
 0x226   :  { %v450_v22 = vpop.permute.xlu1 %449  ;;  %v448_v23 = vpop.permute.xlu0 %447 }
 0x227   :  { %460 = vst.msk [vmem:[#allocation5 + $0x10] sm:$0xff] %vm58_vm2, %v450_v22  ;;  %459 = vst.msk [vmem:[#allocation5] sm:$0xff] %vm58_vm2, %v448_v23 }
 0x22a   :  { %v554_v24 = vpop.permute.xlu1 %553  ;;  %v552_v25 = vpop.permute.xlu0 %551 }
 0x22b   :  { %564 = vst.msk [vmem:[#allocation5 + $0x18] sm:$0xff] %vm83_vm3, %v554_v24  ;;  %563 = vst.msk [vmem:[#allocation5 + $0x8] sm:$0xff] %vm83_vm3, %v552_v25 }
 0x22c   :  { %568 = vst.msk [vmem:[#allocation5 + $0x18] sm:$0xff] %vm108_vm4, %v1003_v2  ;;  %567 = vst.msk [vmem:[#allocation5 + $0x8] sm:$0xff] %vm108_vm4, %v1003_v2 }
 0x22e   :  { %v474_v26 = vpop.permute.xlu1 %473  ;;  %v472_v27 = vpop.permute.xlu0 %471 }
 0x22f   :  { %484 = vst.msk [vmem:[#allocation5 + $0x10] sm:$0xff] %vm83_vm3, %v474_v26  ;;  %483 = vst.msk [vmem:[#allocation5] sm:$0xff] %vm83_vm3, %v472_v27 }
 0x232   :  { %v498_v28 = vpop.permute.xlu1 %497  ;;  %v496_v29 = vpop.permute.xlu0 %495 }
 0x233   :  { %508 = vst.msk [vmem:[#allocation5 + $0x10] sm:$0xff] %vm108_vm4, %v498_v28  ;;  %507 = vst.msk [vmem:[#allocation5] sm:$0xff] %vm108_vm4, %v496_v29  ;;  %v572_v30 = vld [vmem:[#allocation5 + $0x8] sm:$0xff]  ;;  %v574_v31 = vld [vmem:[#allocation5 + $0x18] sm:$0xff] }
 0x234   :  { %v580_v32 = vpack.c.bf16 %v574_v31, %v572_v30 }
 0x236   :  { %v534_v33 = vpop.permute.xlu1 %533  ;;  %v532_v34 = vpop.permute.xlu0 %531  ;;  %743 = vmatprep.mubr.bf16.mxu1 %v580_v32 }
 0x237   :  { %542 = vst.msk [vmem:[#allocation5 + $0x38] sm:$0xff] %vm58_vm2, %v534_v33  ;;  %541 = vst.msk [vmem:[#allocation5 + $0x28] sm:$0xff] %vm58_vm2, %v532_v34 }
 0x23a   :  { %v454_v35 = vpop.permute.xlu1 %453  ;;  %v452_v36 = vpop.permute.xlu0 %451  ;;  %v571_v37 = vld [vmem:[#allocation5] sm:$0xff]  ;;  %v573_v38 = vld [vmem:[#allocation5 + $0x10] sm:$0xff] }
 0x23b   :  { %462 = vst.msk [vmem:[#allocation5 + $0x30] sm:$0xff] %vm58_vm2, %v454_v35  ;;  %461 = vst.msk [vmem:[#allocation5 + $0x20] sm:$0xff] %vm58_vm2, %v452_v36  ;;  %v579_v39 = vpack.c.bf16 %v573_v38, %v571_v37 }
 0x23d   :  { %744 = vmatmul.mubr.bf16.vlgmr.msra.gmra.mrb[0].mxu1 %v579_v39 }
 0x23e   :  { %v558_v40 = vpop.permute.xlu1 %557  ;;  %v556_v41 = vpop.permute.xlu0 %555 }
 0x23f   :  { %566 = vst.msk [vmem:[#allocation5 + $0x38] sm:$0xff] %vm83_vm3, %v558_v40  ;;  %565 = vst.msk [vmem:[#allocation5 + $0x28] sm:$0xff] %vm83_vm3, %v556_v41 }
 0x240   :  { %570 = vst.msk [vmem:[#allocation5 + $0x38] sm:$0xff] %vm108_vm4, %v1003_v2  ;;  %569 = vst.msk [vmem:[#allocation5 + $0x28] sm:$0xff] %vm108_vm4, %v1003_v2 }
 0x242   :  { %v478_v42 = vpop.permute.xlu1 %477  ;;  %v476_v43 = vpop.permute.xlu0 %475 }
 0x243   :  { %486 = vst.msk [vmem:[#allocation5 + $0x30] sm:$0xff] %vm83_vm3, %v478_v42  ;;  %485 = vst.msk [vmem:[#allocation5 + $0x20] sm:$0xff] %vm83_vm3, %v476_v43 }
 0x246   :  { %v502_v44 = vpop.permute.xlu1 %501  ;;  %v500_v45 = vpop.permute.xlu0 %499 }
 0x247   :  { %510 = vst.msk [vmem:[#allocation5 + $0x30] sm:$0xff] %vm108_vm4, %v502_v44  ;;  %509 = vst.msk [vmem:[#allocation5 + $0x20] sm:$0xff] %vm108_vm4, %v500_v45  ;;  %v576_v46 = vld [vmem:[#allocation5 + $0x28] sm:$0xff]  ;;  %v578_v47 = vld [vmem:[#allocation5 + $0x38] sm:$0xff] }
 0x248   :  { %v582_v48 = vpack.c.bf16 %v578_v47, %v576_v46 }
 0x24a   :  { %751 = vmatprep.mubr.bf16.mxu1 %v582_v48 }
 0x24e   :  { %v575_v49 = vld [vmem:[#allocation5 + $0x20] sm:$0xff]  ;;  %v577_v50 = vld [vmem:[#allocation5 + $0x30] sm:$0xff] }
 0x24f   :  { %v581_v51 = vpack.c.bf16 %v577_v50, %v575_v49 }
 0x251   :  { %752 = vmatmul.mubr.bf16.gmra.mrb[4].mxu1 %v581_v51 }
 0x310   :  { %v920_v2 = vpop.f32.mrb[0].mxu1 }
 0x311   :  { %v921_v52 = vpop.f32.mrb[1].mxu1 }
 0x312   :  { %v922_v53 = vadd.f32 %v921_v52, %v920_v2  ;;  %v923_v54 = vpop.f32.mrb[2].mxu1 }
 0x313   :  { %v924_v55 = vpop.f32.mrb[3].mxu1 }
 0x314   :  { %v925_v56 = vadd.f32 %v924_v55, %v923_v54  ;;  %v760_v57 = vsel %vm25_vm0, %v922_v53, 0.0 }
 0x316   :  { %v761_v58 = vsel %vm25_vm0, %v925_v56, 0.0 }
 0x317   :  { %v762_v59 = vadd.f32 %v761_v58, %v760_v57 }
 0x319   :  { %v763_v60 = vrot.slane %v762_v59, 4 }
 0x31b   :  { %v764_v61 = vadd.f32 %v763_v60, %v762_v59 }
 0x31d   :  { %v765_v62 = vrot.slane %v764_v61, 2 }
 0x31f   :  { %v766_v63 = vadd.f32 %v765_v62, %v764_v61 }
 0x321   :  { %v767_v5 = vrot.slane %v766_v63, 1 }
 0x323   :  { %v768_v6 = vadd.f32 %v767_v5, %v766_v63 }
 0x324   :  { %v926_v7 = vpop.f32.mrb[4].mxu1 }
 0x325   :  { %v778_v8 = vmul.f32 0.0625, %v768_v6  ;;  %v927_v9 = vpop.f32.mrb[5].mxu1 }
 0x326   :  { %v928_v10 = vadd.f32 %v927_v9, %v926_v7  ;;  %v929_v11 = vpop.f32.mrb[6].mxu1 }
 0x327   :  { %v780_v12 = vsub.f32 %v922_v53, %v778_v8  ;;  %v781_v13 = vsub.f32 %v925_v56, %v778_v8  ;;  %v930_v14 = vpop.f32.mrb[7].mxu1 }
 0x328   :  { %v931_v15 = vadd.f32 %v930_v14, %v929_v11  ;;  %v769_v18 = vsel %vm25_vm0, %v928_v10, 0.0 }
 0x329   :  { %v784_v16 = vmul.f32 %v780_v12, %v780_v12  ;;  %v785_v17 = vmul.f32 %v781_v13, %v781_v13 }
 0x32a   :  { %v770_v19 = vsel %vm25_vm0, %v931_v15, 0.0 }
 0x32b   :  { %v788_v20 = vsel %vm25_vm0, %v784_v16, 0.0  ;;  %v789_v21 = vsel %vm25_vm0, %v785_v17, 0.0  ;;  %v771_v22 = vadd.f32 %v770_v19, %v769_v18 }
 0x32c   :  { %v790_v23 = vadd.f32 %v789_v21, %v788_v20 }
 0x32d   :  { %v772_v24 = vrot.slane %v771_v22, 4 }
 0x32e   :  { %v791_v25 = vrot.slane %v790_v23, 4 }
 0x32f   :  { %v773_v26 = vadd.f32 %v772_v24, %v771_v22 }
 0x330   :  { %v792_v27 = vadd.f32 %v791_v25, %v790_v23 }
 0x331   :  { %v774_v28 = vrot.slane %v773_v26, 2 }
 0x332   :  { %v793_v29 = vrot.slane %v792_v27, 2 }
 0x333   :  { %v775_v30 = vadd.f32 %v774_v28, %v773_v26 }
 0x334   :  { %v794_v31 = vadd.f32 %v793_v29, %v792_v27 }
 0x335   :  { %v776_v32 = vrot.slane %v775_v30, 1 }
 0x336   :  { %v795_v33 = vrot.slane %v794_v31, 1 }
 0x337   :  { %v777_v34 = vadd.f32 %v776_v32, %v775_v30 }
 0x338   :  { %v796_v35 = vadd.f32 %v795_v33, %v794_v31 }
 0x339   :  { %v779_v36 = vmul.f32 0.0625, %v777_v34 }
 0x33a   :  { %v806_v37 = vmul.f32 0.0625, %v796_v35 }
 0x33b   :  { %v782_v38 = vsub.f32 %v928_v10, %v779_v36  ;;  %v783_v39 = vsub.f32 %v931_v15, %v779_v36 }
 0x33c   :  { %v808_v40 = vadd.f32 1e-05, %v806_v37 }
 0x33d   :  { %v786_v41 = vmul.f32 %v782_v38, %v782_v38  ;;  %v787_v42 = vmul.f32 %v783_v39, %v783_v39 }
 0x33e   :  { %975 = vrsqrt.f32 %v808_v40 }
 0x33f   :  { %v797_v43 = vsel %vm25_vm0, %v786_v41, 0.0  ;;  %v798_v44 = vsel %vm25_vm0, %v787_v42, 0.0 }
 0x340   :  { %v799_v45 = vadd.f32 %v798_v44, %v797_v43 }
 0x342   :  { %v800_v46 = vrot.slane %v799_v45, 4 }
 0x344   :  { %v801_v47 = vadd.f32 %v800_v46, %v799_v45 }
 0x346   :  { %v802_v48 = vrot.slane %v801_v47, 2 }
 0x348   :  { %v976_v49 = vpop.eup %975  ;;  %v803_v50 = vadd.f32 %v802_v48, %v801_v47 }
 0x349   :  { %v812_v51 = vmul.f32 %v976_v49, %v780_v12  ;;  %v813_v2 = vmul.f32 %v976_v49, %v781_v13 }
 0x34a   :  { %v804_v52 = vrot.slane %v803_v50, 1 }
 0x34b   :  { %v816_v53 = vadd.f32 %v812_v51, %v1033_v0  ;;  %v817_v54 = vadd.f32 %v813_v2, %v1038_v1 }
 0x34c   :  { %v805_v55 = vadd.f32 %v804_v52, %v803_v50 }
 0x34d   :  { %v820_v56 = vmax.f32 %v816_v53, 0.0  ;;  %v821_v57 = vmax.f32 %v817_v54, 0.0 }
 0x34e   :  { %v807_v58 = vmul.f32 0.0625, %v805_v55 }
 0x34f   :  { %824 = vst.msk [vmem:[#allocation6] sm:$0xff] %vm25_vm0, %v820_v56  ;;  %825 = vst.msk [vmem:[#allocation6 + $0x8] sm:$0xff] %vm25_vm0, %v821_v57 }
 0x350   :  { %v809_v59 = vadd.f32 1e-05, %v807_v58 }
 0x352   :  { %977 = vrsqrt.f32 %v809_v59 }
 0x35c   :  { %v978_v60 = vpop.eup %977 }
 0x35d   :  { %v814_v61 = vmul.f32 %v978_v60, %v782_v38  ;;  %v815_v62 = vmul.f32 %v978_v60, %v783_v39 }
 0x35f   :  { %v818_v63 = vadd.f32 %v814_v61, %v1055_v3  ;;  %v819_v0 = vadd.f32 %v815_v62, %v1060_v4 }
 0x361   :  { %v822_v1 = vmax.f32 %v818_v63, 0.0  ;;  %v823_v5 = vmax.f32 %v819_v0, 0.0 }
 0x363   :  { %826 = vst.msk [vmem:[#allocation6 + $0x10] sm:$0xff] %vm25_vm0, %v822_v1  ;;  %827 = vst.msk [vmem:[#allocation6 + $0x18] sm:$0xff] %vm25_vm0, %v823_v5 }
 0x364   :  { %990 = shalt.err (!%p987_p4)
}
 0x365   :  { %s991_s6 = scalar_lea.hbm %s1327_s3, 512 }
 0x366   :  { %p992_p5 = scmp.ne.s32.totalorder %s1327_s3, %s991_s6  ;;  %p995_p6 = scmp.lt.u32.totalorder %s991_s6, %s1327_s3 }
 0x368   :  { %p997_p7 = pnand %p995_p6, %p992_p5 }
 0x36a   :  { %1000 = shalt.err (!%p997_p7)
}
 0x36b   :  { %s1008_s12 = smov 128   ;;  %s1009_s13 = smov 8  }
 0x36c   :  { %839 = dma.vmem_to_hbm [thread:$0]  %s834_s29, 512, %s1327_s3, [#allocation7], %s1008_s12, %s1008_s12, %s1009_s13  }
 0x36d   :  { %1001 = dma.done.wait [#allocation7], 512  }
 0x36e   :  { %1002 = vsyncadd [#allocation7], 4294966784 }
 0x36f   :  { %843 = vsyncpa [#allocation7], 1 }

</bundles_post_ra>
